<compile_context>
chip_gen: v6e
topology: v6e:2x2x1
jax: 0.10.0
libtpu: 0.0.40
codegen_flags: <defaults>
</compile_context>

<pallas_src>
import functools

import jax
import jax.numpy as jnp
import numpy as np
from jax.experimental import pallas as pl
from jax.experimental.pallas import tpu as pltpu


_MAX_BLOCK_POINTS = 32768         # max batch-tile (points); h is only [32, 32768] f32 ~ 4 MB
_VMEM_LIMIT_BYTES = 48 << 20      # safe on v5e/v6e (128 MiB phys) and v7x (64 MiB phys)


def _default_tanh_dtype():
    """bf16 tanh on bf16-capable EUPs (v6e/v7x); f32 elsewhere (v5e & older)."""
    try:
        kind = jax.devices()[0].device_kind.lower()
    except Exception:  # pragma: no cover
        return jnp.float32
    if "v6" in kind or "v7" in kind:
        return jnp.bfloat16
    return jnp.float32


def _choose_block(n, block_n=None):
    """Pick (block, grid_n): block a multiple of 128, grid_n >= 2 (even when
    possible) for the v7x 2-TC split, block <= _MAX_BLOCK_POINTS, minimal pad."""
    n_lanes = pl.cdiv(n, 128)
    if block_n is not None:
        block_lanes = max(1, pl.cdiv(int(block_n), 128))
    else:
        grid_n = max(2, pl.cdiv(n_lanes * 128, _MAX_BLOCK_POINTS))
        if grid_n % 2:
            grid_n += 1                      # even step count -> both v7x TCs busy
        block_lanes = pl.cdiv(n_lanes, grid_n)
    block = block_lanes * 128
    grid_n = pl.cdiv(n_lanes, block_lanes)   # actual step count (>=1)
    return block, grid_n


def _mlp_kernel(num_middle, tanh_dtype, x_ref, *refs):
    """Transposed MLP body.  Activations are [features, batch_tile].

    refs layout:
      w_in_t, b_in, (w_mid_t_i, b_mid_i) * num_middle, w_out_t, b_out, out_ref
    Weights are pre-transposed to [fan_out, fan_in]; biases are [fan_out, 1].
    """
    out_ref = refs[-1]
    param_refs = refs[:-1]

    f32 = jnp.float32
    bf16_tanh = np.dtype(tanh_dtype) != np.dtype(np.float32)

    def act(pre):
        # tanh on the single EUP slot is the binding unit at hidden=32.  On
        # v6e/v7x a packed bf16 tanh halves the EUP vreg count; the dot
        # accumulation stays f32 (MXU has large slack, no precision loss there).
        if bf16_tanh:
            return jnp.tanh(pre.astype(tanh_dtype)).astype(f32)
        return jnp.tanh(pre)

    xt = x_ref[...].astype(f32)                  # [input_dim, block_n]
    input_dim, block_n = xt.shape

    w_in_t = param_refs[0][...]                  # [hidden, input_dim]
    b_in = param_refs[1][...]                    # [hidden, 1]

    # Input layer: K = input_dim is tiny (3 for Allen-Cahn 2D: x, y, t), so do
    # it with broadcasted VPU FMAs instead of an MXU push/pop per step.
    if input_dim <= 8:
        h = jnp.broadcast_to(b_in, (b_in.shape[0], block_n))
        for k in range(input_dim):               # static unroll
            h = h + w_in_t[:, k:k + 1] * xt[k:k + 1, :]
    else:
        h = jnp.dot(w_in_t, xt, preferred_element_type=f32) + b_in
    h = act(h)                                   # [hidden, block_n]

    # Middle layers: lane-dense MXU matmuls (N = batch fills the lanes).
    idx = 2
    for _ in range(num_middle):
        w_t = param_refs[idx][...]               # [hidden, hidden]
        b = param_refs[idx + 1][...]             # [hidden, 1]
        idx += 2
        h = act(jnp.dot(w_t, h, preferred_element_type=f32) + b)

    # Output layer (no activation).
    w_out_t = param_refs[idx][...]               # [output_dim, hidden]
    b_out = param_refs[idx + 1][...]             # [output_dim, 1]
    y = jnp.dot(w_out_t, h, preferred_element_type=f32) + b_out

    out_ref[...] = y.astype(out_ref.dtype)       # [output_dim, block_n] lane-dense


def mlp_forward_t(x_t, params, *, block_n=None, tanh_dtype=None,
                  vmem_limit_bytes=_VMEM_LIMIT_BYTES):
    """Fast path (no transpose round-trip): x_t is [input_dim, N];
    returns [output_dim, N].  params: list of (W, b), W [fan_in, fan_out], b [fan_out]."""
    input_dim, n = x_t.shape
    output_dim = params[-1][0].shape[1]
    num_middle = len(params) - 2
    if tanh_dtype is None:
        tanh_dtype = _default_tanh_dtype()

    block, grid_n = _choose_block(n, block_n)
    n_pad = grid_n * block

    x_t = jnp.asarray(x_t, jnp.float32)
    if n_pad != n:
        # Minimal padding only (block is chosen to track n, not a fixed tile).
        x_t = jnp.pad(x_t, ((0, 0), (0, n_pad - n)))

    in_specs = [pl.BlockSpec((input_dim, block), lambda i: (0, i))]
    flat_params = []
    for (w, b) in params:
        w_t = jnp.asarray(w, jnp.float32).T               # [fan_out, fan_in]
        b_c = jnp.asarray(b, jnp.float32).reshape(-1, 1)  # [fan_out, 1]
        # Grid-invariant blocks (constant index_map) -> DMA'd once, stay
        # resident in VMEM across all grid steps.
        in_specs.append(pl.BlockSpec(w_t.shape, lambda i: (0, 0)))
        in_specs.append(pl.BlockSpec(b_c.shape, lambda i: (0, 0)))
        flat_params.extend([w_t, b_c])

    out_specs = pl.BlockSpec((output_dim, block), lambda i: (0, i))

    # Advisory cost estimate (padded work) so XLA schedules this small call
    # sensibly against the surrounding PINN autodiff graph.
    dims = [p[0].shape[0] for p in params] + [output_dim]
    flops = 2 * n_pad * sum(a * b for a, b in zip(dims[:-1], dims[1:]))
    transcendentals = n_pad * sum(p[0].shape[1] for p in params[:-1])
    bytes_accessed = 4 * (
        x_t.size
        + sum(w.size + b.size for w, b in params)
        + n_pad * output_dim
    )

    kernel = functools.partial(_mlp_kernel, num_middle, tanh_dtype)

    out_t = pl.pallas_call(
        kernel,
        out_shape=jax.ShapeDtypeStruct((output_dim, n_pad), jnp.float32),
        grid_spec=pltpu.PrefetchScalarGridSpec(
            num_scalar_prefetch=0,
            grid=(grid_n,),
            in_specs=in_specs,
            out_specs=out_specs,
        ),
        compiler_params=pltpu.CompilerParams(
            dimension_semantics=("parallel",),
            vmem_limit_bytes=vmem_limit_bytes,
        ),
        cost_estimate=pl.CostEstimate(
            flops=flops,
            transcendentals=transcendentals,
            bytes_accessed=bytes_accessed,
        ),
    )(x_t, *flat_params)

    if n_pad != n:
        out_t = out_t[:, :n]
    return out_t                                 # [output_dim, N]


def mlp_forward(x, params, **kwargs):
    """PyTorch-layout convenience wrapper: x [N, input_dim] -> [N, output_dim].
    For the training loop, prefer keeping points in [input_dim, N] layout and
    calling mlp_forward_t directly (avoids the transpose round-trip in HBM)."""
    return mlp_forward_t(jnp.asarray(x, jnp.float32).T, params, **kwargs).T


def init_params(key, input_dim, hidden_dim, output_dim, num_layers):
    """Deterministic init mimicking nn.Linear default (U[-1/sqrt(fan_in), +])."""
    dims = [input_dim] + [hidden_dim] * (num_layers - 1) + [output_dim]
    params = []
    for fan_in, fan_out in zip(dims[:-1], dims[1:]):
        key, kw, kb = jax.random.split(key, 3)
        bound = 1.0 / (fan_in ** 0.5)
        w = jax.random.uniform(
            kw, (fan_in, fan_out), jnp.float32, minval=-bound, maxval=bound
        )
        b = jax.random.uniform(
            kb, (fan_out,), jnp.float32, minval=-bound, maxval=bound
        )
        params.append((w, b))
    return params


def reference_forward(x, params):
    h = jnp.tanh(x @ params[0][0] + params[0][1])
    for w, b in params[1:-1]:
        h = jnp.tanh(h @ w + b)
    return h @ params[-1][0] + params[-1][1]


if __name__ == "__main__":
    # Small shapes consistent with the Allen-Cahn 2D PINN:
    # input_dim=3 (x, y, t), hidden_dim=32, output_dim=1, num_layers=4
    input_dim, hidden_dim, output_dim, num_layers = 3, 32, 1, 4
    batch = 256

    key = jax.random.PRNGKey(0)
    key, kx = jax.random.split(key)
    x = jax.random.normal(kx, (batch, input_dim), jnp.float32)

    params = init_params(key, input_dim, hidden_dim, output_dim, num_layers)
    ref = reference_forward(x, params)

    # 1) f32 tanh path (exact semantics), auto block: n=256 -> 2x128 grid steps.
    out = jax.block_until_ready(mlp_forward(x, params, tanh_dtype=jnp.float32))
    assert out.shape == (batch, output_dim)
    assert jnp.allclose(out, ref, atol=1e-5, rtol=1e-5), "f32 mismatch vs reference"

    # 2) Pre-transposed fast path (no wrapper transpose), f32 tanh.
    out_t = jax.block_until_ready(
        mlp_forward_t(x.T, params, tanh_dtype=jnp.float32)
    )
    assert out_t.shape == (output_dim, batch)
    assert jnp.allclose(out_t.T, ref, atol=1e-5, rtol=1e-5), "transposed-path mismatch"

    # 3) Ragged batch (not a multiple of 128) exercises the minimal-padding path.
    x2 = x[:200]
    out2 = jax.block_until_ready(mlp_forward(x2, params, tanh_dtype=jnp.float32))
    ref2 = reference_forward(x2, params)
    assert out2.shape == (200, output_dim)
    assert jnp.allclose(out2, ref2, atol=1e-5, rtol=1e-5), "ragged mismatch"

    # 4) bf16-tanh path (EUP optimization for v6e/v7x); relaxed tolerance per review.
    out_bf16 = jax.block_until_ready(
        mlp_forward(x, params, tanh_dtype=jnp.bfloat16)
    )
    assert jnp.allclose(out_bf16, ref, atol=5e-2, rtol=5e-2), "bf16-tanh mismatch"

    # 5) Larger batch exercising the waste-minimizing block selection
    #    (n=2200 -> block=1152, grid=2, pad 104 columns instead of ~1900).
    key, kx2 = jax.random.split(key)
    x3 = jax.random.normal(kx2, (2200, input_dim), jnp.float32)
    out3 = jax.block_until_ready(mlp_forward(x3, params, tanh_dtype=jnp.float32))
    ref3 = reference_forward(x3, params)
    assert out3.shape == (2200, output_dim)
    assert jnp.allclose(out3, ref3, atol=1e-5, rtol=1e-5), "large-batch mismatch"

    print("KERNEL_OK")
</pallas_src>

<mosaic_0001>
module attributes {stable_mosaic.version = 11 : i64} {
  func.func @_mlp_kernel(%arg0: i32, %arg1: memref<3x128xf32, #tpu.memory_space<vmem>>, %arg2: memref<32x3xf32, #tpu.memory_space<vmem>>, %arg3: memref<32x1xf32, #tpu.memory_space<vmem>>, %arg4: memref<32x32xf32, #tpu.memory_space<vmem>>, %arg5: memref<32x1xf32, #tpu.memory_space<vmem>>, %arg6: memref<32x32xf32, #tpu.memory_space<vmem>>, %arg7: memref<32x1xf32, #tpu.memory_space<vmem>>, %arg8: memref<1x32xf32, #tpu.memory_space<vmem>>, %arg9: memref<1x1xf32, #tpu.memory_space<vmem>>, %arg10: memref<1x128xf32, #tpu.memory_space<vmem>>) attributes {dimension_semantics = [#tpu.dimension_semantics<parallel>], iteration_bounds = array<i64: 2>, scalar_prefetch = 0 : i64, scratch_operands = 0 : i64, tpu.core_type = #tpu.core_type<tc>, window_params = [{transform_indices = @transform_0, window_bounds = array<i64: 3, 128>}, {pipeline_mode = #tpu.pipeline_mode<synchronous>, transform_indices = @transform_1, window_bounds = array<i64: 32, 3>}, {pipeline_mode = #tpu.pipeline_mode<synchronous>, transform_indices = @transform_2, window_bounds = array<i64: 32, 1>}, {pipeline_mode = #tpu.pipeline_mode<synchronous>, transform_indices = @transform_3, window_bounds = array<i64: 32, 32>}, {pipeline_mode = #tpu.pipeline_mode<synchronous>, transform_indices = @transform_4, window_bounds = array<i64: 32, 1>}, {pipeline_mode = #tpu.pipeline_mode<synchronous>, transform_indices = @transform_5, window_bounds = array<i64: 32, 32>}, {pipeline_mode = #tpu.pipeline_mode<synchronous>, transform_indices = @transform_6, window_bounds = array<i64: 32, 1>}, {pipeline_mode = #tpu.pipeline_mode<synchronous>, transform_indices = @transform_7, window_bounds = array<i64: 1, 32>}, {pipeline_mode = #tpu.pipeline_mode<synchronous>, transform_indices = @transform_8, window_bounds = array<i64: 1, 1>}, {transform_indices = @transform_9, window_bounds = array<i64: 1, 128>}]} {
    %c0 = arith.constant 0 : index
    %c0_0 = arith.constant 0 : index
    %0 = vector.load %arg1[%c0, %c0_0] : memref<3x128xf32, #tpu.memory_space<vmem>>, vector<3x128xf32>
    %c0_1 = arith.constant 0 : index
    %c0_2 = arith.constant 0 : index
    %1 = vector.load %arg2[%c0_1, %c0_2] : memref<32x3xf32, #tpu.memory_space<vmem>>, vector<32x3xf32>
    %c0_3 = arith.constant 0 : index
    %c0_4 = arith.constant 0 : index
    %2 = vector.load %arg3[%c0_3, %c0_4] : memref<32x1xf32, #tpu.memory_space<vmem>>, vector<32x1xf32>
    %3 = vector.shape_cast %2 : vector<32x1xf32> to vector<32x1xf32>
    %4 = vector.broadcast %3 : vector<32x1xf32> to vector<32x128xf32>
    %5 = vector.extract_strided_slice %1 {offsets = [0, 0], sizes = [32, 1], strides = [1, 1]} : vector<32x3xf32> to vector<32x1xf32>
    %6 = vector.extract_strided_slice %0 {offsets = [0, 0], sizes = [1, 128], strides = [1, 1]} : vector<3x128xf32> to vector<1x128xf32>
    %7 = vector.broadcast %5 : vector<32x1xf32> to vector<32x128xf32>
    %8 = vector.broadcast %6 : vector<1x128xf32> to vector<32x128xf32>
    %9 = arith.mulf %7, %8 : vector<32x128xf32>
    %10 = arith.addf %4, %9 : vector<32x128xf32>
    %11 = vector.extract_strided_slice %1 {offsets = [0, 1], sizes = [32, 1], strides = [1, 1]} : vector<32x3xf32> to vector<32x1xf32>
    %12 = vector.extract_strided_slice %0 {offsets = [1, 0], sizes = [1, 128], strides = [1, 1]} : vector<3x128xf32> to vector<1x128xf32>
    %13 = vector.broadcast %11 : vector<32x1xf32> to vector<32x128xf32>
    %14 = vector.broadcast %12 : vector<1x128xf32> to vector<32x128xf32>
    %15 = arith.mulf %13, %14 : vector<32x128xf32>
    %16 = arith.addf %10, %15 : vector<32x128xf32>
    %17 = vector.extract_strided_slice %1 {offsets = [0, 2], sizes = [32, 1], strides = [1, 1]} : vector<32x3xf32> to vector<32x1xf32>
    %18 = vector.extract_strided_slice %0 {offsets = [2, 0], sizes = [1, 128], strides = [1, 1]} : vector<3x128xf32> to vector<1x128xf32>
    %19 = vector.broadcast %17 : vector<32x1xf32> to vector<32x128xf32>
    %20 = vector.broadcast %18 : vector<1x128xf32> to vector<32x128xf32>
    %21 = arith.mulf %19, %20 : vector<32x128xf32>
    %22 = arith.addf %16, %21 : vector<32x128xf32>
    %23 = math.tanh %22 : vector<32x128xf32>
    %c0_5 = arith.constant 0 : index
    %c0_6 = arith.constant 0 : index
    %24 = vector.load %arg4[%c0_5, %c0_6] : memref<32x32xf32, #tpu.memory_space<vmem>>, vector<32x32xf32>
    %c0_7 = arith.constant 0 : index
    %c0_8 = arith.constant 0 : index
    %25 = vector.load %arg5[%c0_7, %c0_8] : memref<32x1xf32, #tpu.memory_space<vmem>>, vector<32x1xf32>
    %cst = arith.constant dense<0.000000e+00> : vector<32x128xf32>
    %26 = tpu.matmul %24, %23, %cst {dimension_numbers = #tpu.dot_dimension_numbers<[1], [0], [0], [1], [0, 0, 1, 1], [], []>} : vector<32x32xf32>, vector<32x128xf32>, vector<32x128xf32> -> vector<32x128xf32>
    %27 = vector.broadcast %25 : vector<32x1xf32> to vector<32x128xf32>
    %28 = arith.addf %26, %27 : vector<32x128xf32>
    %29 = math.tanh %28 : vector<32x128xf32>
    %c0_9 = arith.constant 0 : index
    %c0_10 = arith.constant 0 : index
    %30 = vector.load %arg6[%c0_9, %c0_10] : memref<32x32xf32, #tpu.memory_space<vmem>>, vector<32x32xf32>
    %c0_11 = arith.constant 0 : index
    %c0_12 = arith.constant 0 : index
    %31 = vector.load %arg7[%c0_11, %c0_12] : memref<32x1xf32, #tpu.memory_space<vmem>>, vector<32x1xf32>
    %cst_13 = arith.constant dense<0.000000e+00> : vector<32x128xf32>
    %32 = tpu.matmul %30, %29, %cst_13 {dimension_numbers = #tpu.dot_dimension_numbers<[1], [0], [0], [1], [0, 0, 1, 1], [], []>} : vector<32x32xf32>, vector<32x128xf32>, vector<32x128xf32> -> vector<32x128xf32>
    %33 = vector.broadcast %31 : vector<32x1xf32> to vector<32x128xf32>
    %34 = arith.addf %32, %33 : vector<32x128xf32>
    %35 = math.tanh %34 : vector<32x128xf32>
    %c0_14 = arith.constant 0 : index
    %c0_15 = arith.constant 0 : index
    %36 = vector.load %arg8[%c0_14, %c0_15] : memref<1x32xf32, #tpu.memory_space<vmem>>, vector<1x32xf32>
    %c0_16 = arith.constant 0 : index
    %c0_17 = arith.constant 0 : index
    %37 = vector.load %arg9[%c0_16, %c0_17] : memref<1x1xf32, #tpu.memory_space<vmem>>, vector<1x1xf32>
    %cst_18 = arith.constant dense<0.000000e+00> : vector<1x128xf32>
    %38 = tpu.matmul %36, %35, %cst_18 {dimension_numbers = #tpu.dot_dimension_numbers<[1], [0], [0], [1], [0, 0, 1, 1], [], []>} : vector<1x32xf32>, vector<32x128xf32>, vector<1x128xf32> -> vector<1x128xf32>
    %39 = vector.broadcast %37 : vector<1x1xf32> to vector<1x128xf32>
    %40 = arith.addf %38, %39 : vector<1x128xf32>
    %c0_19 = arith.constant 0 : index
    %c0_20 = arith.constant 0 : index
    %41 = vector.load %arg10[%c0_19, %c0_20] : memref<1x128xf32, #tpu.memory_space<vmem>>, vector<1x128xf32>
    tpu.vector_store %arg10[%c0_19, %c0_20], %40 {strides = array<i32>} : memref<1x128xf32, #tpu.memory_space<vmem>>, vector<1x128xf32>,
    return
  }
  func.func @transform_0(%arg0: i32) -> (i32, i32) {
    %c0_i32 = arith.constant 0 : i32
    %c0_i32_0 = arith.constant 0 : i32
    return %c0_i32, %arg0 : i32, i32
  }
  func.func @transform_1(%arg0: i32) -> (i32, i32) {
    %c0_i32 = arith.constant 0 : i32
    %c0_i32_0 = arith.constant 0 : i32
    %c0_i32_1 = arith.constant 0 : i32
    return %c0_i32, %c0_i32_0 : i32, i32
  }
  func.func @transform_2(%arg0: i32) -> (i32, i32) {
    %c0_i32 = arith.constant 0 : i32
    %c0_i32_0 = arith.constant 0 : i32
    %c0_i32_1 = arith.constant 0 : i32
    return %c0_i32, %c0_i32_0 : i32, i32
  }
  func.func @transform_3(%arg0: i32) -> (i32, i32) {
    %c0_i32 = arith.constant 0 : i32
    %c0_i32_0 = arith.constant 0 : i32
    %c0_i32_1 = arith.constant 0 : i32
    return %c0_i32, %c0_i32_0 : i32, i32
  }
  func.func @transform_4(%arg0: i32) -> (i32, i32) {
    %c0_i32 = arith.constant 0 : i32
    %c0_i32_0 = arith.constant 0 : i32
    %c0_i32_1 = arith.constant 0 : i32
    return %c0_i32, %c0_i32_0 : i32, i32
  }
  func.func @transform_5(%arg0: i32) -> (i32, i32) {
    %c0_i32 = arith.constant 0 : i32
    %c0_i32_0 = arith.constant 0 : i32
    %c0_i32_1 = arith.constant 0 : i32
    return %c0_i32, %c0_i32_0 : i32, i32
  }
  func.func @transform_6(%arg0: i32) -> (i32, i32) {
    %c0_i32 = arith.constant 0 : i32
    %c0_i32_0 = arith.constant 0 : i32
    %c0_i32_1 = arith.constant 0 : i32
    return %c0_i32, %c0_i32_0 : i32, i32
  }
  func.func @transform_7(%arg0: i32) -> (i32, i32) {
    %c0_i32 = arith.constant 0 : i32
    %c0_i32_0 = arith.constant 0 : i32
    %c0_i32_1 = arith.constant 0 : i32
    return %c0_i32, %c0_i32_0 : i32, i32
  }
  func.func @transform_8(%arg0: i32) -> (i32, i32) {
    %c0_i32 = arith.constant 0 : i32
    %c0_i32_0 = arith.constant 0 : i32
    %c0_i32_1 = arith.constant 0 : i32
    return %c0_i32, %c0_i32_0 : i32, i32
  }
  func.func @transform_9(%arg0: i32) -> (i32, i32) {
    %c0_i32 = arith.constant 0 : i32
    %c0_i32_0 = arith.constant 0 : i32
    return %c0_i32, %arg0 : i32, i32
  }
}

</mosaic_0001>

<bundles_post_ra>
// kernel: tpu_custom_call.1
= control target key start
LH: loop header
LB: loop body
LE: loop exit
PB: predicated region body
PF: predicated region fallthrough
CT: control target
= control target key end

     0   :  { %s1328_s0 = inlined_call_operand.vmem [shape: f32[3,256], index: 0, kind: input, shape index: {}]   ;;  %s1329_s1 = inlined_call_operand.vmem [shape: f32[32,3], index: 1, kind: input, shape index: {}]   ;;  %s1330_s2 = inlined_call_operand.vmem [shape: f32[32,1], index: 2, kind: input, shape index: {}]   ;;  %s1331_s3 = inlined_call_operand.vmem [shape: f32[32,32], index: 3, kind: input, shape index: {}]   ;;  %s1332_s4 = inlined_call_operand.vmem [shape: f32[32,1], index: 4, kind: input, shape index: {}]   ;;  %s1333_s5 = inlined_call_operand.vmem [shape: f32[32,32], index: 5, kind: input, shape index: {}]   ;;  %s1334_s6 = inlined_call_operand.vmem [shape: f32[32,1], index: 6, kind: input, shape index: {}]   ;;  %s1335_s7 = inlined_call_operand.vmem [shape: f32[1,32], index: 7, kind: input, shape index: {}]   ;;  %s1336_s8 = inlined_call_operand.<no memory space> [shape: f32[1,1], index: 8, kind: input, shape index: {}]   ;;  %s1337_s9 = inlined_call_operand.hbm [shape: f32[1,256], index: 9, kind: output, shape index: {}]  }
   0x1   :  { %v14_v0 = vstv %s1336_s8 }
   0x2   :  { %15 = vst [vmem:[#allocation2] sm:$0x1] %v14_v0 }
   0x3   :  { %16 = vsyncpa [#allocation4], 0 }
   0x4   :  { %18 = vsyncpa [#allocation4 + $0x1], 0  ;;  %s1142_s11 = smov 0   ;;  %s1144_s12 = smov 0  }
   0x5   :  { %s1146_s13 = smov 0   ;;  %s1148_s14 = smov 0  }
   0x6 LB: > { %s1163_s8 = sadd.s32 4294967295, %s1081_s14   ;;  %s862_s15 = sadd.s32 4294967294, %s1081_s14   ;;  %s1081_s14 = sphi %s1148_s14, %s1343_s14   ;;  %s1077_s13 = sphi %s1146_s13, %s1342_s13   ;;  %s1073_s12 = sphi %s1144_s12, %s1341_s12   ;;  %s1069_s11 = sphi %s1142_s11, %s1340_s11  }
   0x7   : > { %s1167_s16 = sadd.s32 1, %s1081_s14   ;;  %s225_s17 = sadd.s32 1, %s1077_s13 }
   0x8   : > { %s222_s18 = ssub.s32 %s1081_s14, %s1167_s16  ;;  %p235_p0 = scmp.ne.s32.totalorder %s1077_s13, %s1073_s12 }
   0x9   : > { %p223_p1 = scmp.eq.s32.totalorder %s222_s18, 0  ;;  %p236_p2 = scmp.eq.s32.totalorder %s1163_s8, 1 }
   0xa   : > { %p241_p3 = scmp.ne.s32.totalorder %s1073_s12, %s1069_s11  ;;  %p242_p4 = scmp.eq.s32.totalorder %s862_s15, 1 }
   0xb   : > { %s1178_s19 = scalar_select %p223_p1, %s1077_s13, %s225_s17  }
   0xc   : > { %p1180_p5 = por %p236_p2, %p235_p0  ;;  %p1184_p6 = por %p242_p4, %p241_p3 }
   0xd   : > { %p865_p7 = scmp.ge.s32.totalorder %s1081_s14, 1  ;;  %p291_p8 = scmp.lt.s32.totalorder %s1081_s14, 3 }
   0xf   : > { %p292_p9 = pnand %p865_p7, %p291_p8 }
  0x10   : > { %p325_p10 = scmp.lt.s32.totalorder (!%p292_p9), %s1163_s8, 1  ;;  %s323_s25 = sand.u32 (!%p292_p9), 1, %s1073_s12  }
  0x11   : > { %295 = sbr.rel (%p292_p9) target bundleno = 857 (0x359), region = 56  ;;  %s876_s26 = sshll.u32 (!%p292_p9), %s1163_s8, 4 }
  0x12   : > { %s324_s27 = scalar_lea.vmem (!%p292_p9), [#allocation3], %s323_s25  ;;  %s795_s15 = scalar_lea.sflag (!%p292_p9), [#allocation4], %s323_s25 }
  0x13   : > { %s807_s28 = sshll.u32 (!%p292_p9), %s324_s27, 4  ;;  %s808_s28 = int_to_ptr.vmem [resolvable:$true] %s807_s28 }
  0x14   : > { %s1021_s17 = scalar_lea.vmem (!%p292_p9), %s808_s28, 16 }
  0x15   : > { %p1022_p11 = scmp.ne.s32.totalorder (!%p292_p9), %s808_s28, %s1021_s17 }
  0x16   : > { %v332_v1 = vld [vmem:[%s1329_s1 + $0x10] sm:$0xff]  ;;  %v1083_v2 = vmov 1   ;;  %v1084_v3 = vmov 0   ;;  %v333_v4 = vld [vmem:[%s1329_s1 + $0x18] sm:$0xff]  ;;  %v331_v6 = vld [vmem:[%s1329_s1 + $0x8] sm:$0xff]  ;;  %v1085_v8 = vmov 2   ;;  %v378_v22 = vlaneseq }
  0x17   : > { %986 = vset.pattern.permute.xlu0 %v1083_v2  ;;  %983 = vset.pattern.permute.xlu1 %v1084_v3  ;;  %v337_v5 = vld [vmem:[%s1330_s2 + $0x18] sm:$0xff]  ;;  %v336_v7 = vld [vmem:[%s1330_s2 + $0x10] sm:$0xff]  ;;  %v330_v9 = vld [vmem:[%s1329_s1] sm:$0xff]  ;;  %vm478_vm0 = vcmask 261120   ;;  %s326_s30 = scalar_select %p325_p10, %s1163_s8, 1  ;;  %vm1087_vm1 = vmmov 0  }
  0x18   : > { %399 = vperm.xlu0 %986, %v332_v1   ;;  %370 = vperm.xlu1 %983, %v332_v1   ;;  %v335_v10 = vld [vmem:[%s1330_s2 + $0x8] sm:$0xff]  ;;  %v334_v11 = vld [vmem:[%s1330_s2] sm:$0xff]  ;;  %v457_v13 = vld [vmem:[%s1332_s4 + $0x18] sm:$0xff]  ;;  %v1244_v23 = vshrl.u32 %v378_v22, 7  ;;  %p1023_p12 = pnand %p1022_p11, %p1180_p5  ;;  %s1088_s8 = smov [#allocation3]  }
  0x19   : > { %v450_v12 = vld [vmem:[%s1331_s3] sm:$0xff]  ;;  %v456_v14 = vld [vmem:[%s1332_s4 + $0x10] sm:$0xff]  ;;  %v455_v15 = vld [vmem:[%s1332_s4 + $0x8] sm:$0xff]  ;;  %s866_s10 = sshll.u32 %s326_s30, 2 }
  0x1a   : > { %908 = vmatprep.mubr.msk.f32.mxu0 %vm478_vm0, %v450_v12  ;;  %v587_v16 = vld [vmem:[%s1334_s6 + $0x18] sm:$0xff]  ;;  %v454_v17 = vld [vmem:[%s1332_s4] sm:$0xff]  ;;  %v585_v18 = vld [vmem:[%s1334_s6 + $0x8] sm:$0xff]  ;;  %s328_s18 = scalar_lea.vmem %s1328_s0, %s866_s10  ;;  %v380_v26 = vsub.s32 0, %v1244_v23  ;;  %v408_v31 = vsub.s32 1, %v1244_v23  ;;  %v436_v33 = vsub.s32 2, %v1244_v23  ;;  %s1293_s10 = scalar_lea.hbm %s1337_s9, %s876_s26 }
  0x1b   : > { %v586_v19 = vld [vmem:[%s1334_s6 + $0x10] sm:$0xff]  ;;  %v710_v20 = vld [vmem:[#allocation2] sm:$0x1]  ;;  %p1024_p13 = pneg %p1023_p12 }
  0x1c   : > { %987 = vset.pattern.permute.xlu0 %v1084_v3  ;;  %984 = vset.pattern.permute.xlu1 %v1083_v2  ;;  %v584_v21 = vld [vmem:[%s1334_s6] sm:$0xff]  ;;  %v452_v12 = vld [vmem:[%s1331_s3 + $0x10] sm:$0xff] }
  0x1d   : > { %375 = vperm.xlu0 %987, %v333_v4   ;;  %403 = vperm.xlu1 %984, %v333_v4   ;;  %v329_v27 = vld [vmem:[%s328_s18] sm:$0x7]  ;;  %s1025_s18 = sshll.u32 %s1088_s8, 4  ;;  %s1026_s18 = int_to_ptr.vmem [resolvable:$false] %s1025_s18 }
  0x1e   : > { %v381_v30 = vrot.slane %v329_v27, %v380_v26  ;;  %v409_v35 = vrot.slane %v329_v27, %v408_v31  ;;  %v437_v38 = vrot.slane %v329_v27, %v436_v33  ;;  %v581_v33 = vld [vmem:[%s1333_s5 + $0x8] sm:$0xff]  ;;  %s1027_s22 = scalar_lea.vmem %s1026_s18, 32  ;;  %p1028_p0 = scmp.lt.s32.totalorder %s808_s28, %s1026_s18 }
  0x1f   : > { %p1029_p1 = scmp.lt.s32.totalorder %s1027_s22, %s1021_s17 }
  0x21   : > { %355 = vperm.xlu0 %987, %v337_v5   ;;  %985 = vset.pattern.permute.xlu1 %v1084_v3  ;;  %p1030_p2 = por %p1029_p1, %p1028_p0 }
  0x22   : > { %365 = vperm.xlu1 %985, %v331_v6  }
  0x23   : > { %p1031_p3 = pnand %p1030_p2, %p1024_p13 }
  0x25   : > { %350 = vperm.xlu0 %987, %v336_v7  }
  0x26   : > { %988 = vset.pattern.permute.xlu1 %v1085_v8 }
  0x27   : > { %431 = vperm.xlu1 %988, %v333_v4  }
  0x29   : > { %360 = vperm.xlu0 %987, %v330_v9  }
  0x2b   : > { %989 = vset.pattern.permute.xlu1 %v1084_v3 }
  0x2c   : > { %345 = vperm.xlu1 %989, %v335_v10  }
  0x2d   : > { %340 = vperm.xlu0 %987, %v334_v11   ;;  %v451_v11 = vld [vmem:[%s1331_s3 + $0x8] sm:$0xff] }
  0x30   : > { %990 = vset.pattern.permute.xlu1 %v1083_v2 }
  0x31   : > { %395 = vperm.xlu1 %990, %v331_v6   ;;  %993 = vset.pattern.permute.xlu0 %v1085_v8 }
  0x32   : > { %423 = vperm.xlu0 %993, %v331_v6  }
  0x35   : > { %991 = vset.pattern.permute.xlu1 %v1085_v8 }
  0x36   : > { %427 = vperm.xlu1 %991, %v332_v1   ;;  %996 = vset.pattern.permute.xlu0 %v1084_v3 }
  0x37   : > { %470 = vperm.xlu0 %996, %v456_v14   ;;  %v580_v14 = vld [vmem:[%s1333_s5] sm:$0xff] }
  0x38   : > { %922 = vmatprep.mubr.msk.f32.mxu1 %vm478_vm0, %v580_v14 }
  0x3a   : > { %992 = vset.pattern.permute.xlu1 %v1083_v2 }
  0x3b   : > { %391 = vperm.xlu1 %992, %v330_v9   ;;  %605 = vperm.xlu0 %996, %v587_v16  }
  0x3f   : > { %994 = vset.pattern.permute.xlu1 %v1085_v8  ;;  %595 = vperm.xlu0 %996, %v585_v18  }
  0x40   : > { %419 = vperm.xlu1 %994, %v330_v9  }
  0x43   : > { %713 = vperm.xlu0 %996, %v710_v20  }
  0x44   : > { %995 = vset.pattern.permute.xlu1 %v1084_v3 }
  0x45   : > { %475 = vperm.xlu1 %995, %v457_v13   ;;  %v453_v13 = vld [vmem:[%s1331_s3 + $0x18] sm:$0xff] }
  0x49   : > { %465 = vperm.xlu1 %995, %v455_v15  }
  0x4d   : > { %460 = vperm.xlu1 %995, %v454_v17  }
  0x51   : > { %600 = vperm.xlu1 %995, %v586_v19  }
  0x55   : > { %590 = vperm.xlu1 %995, %v584_v21  }
  0x93   : > { %v371_v24 = vpop.permute.xlu1 %370  ;;  %v400_v25 = vpop.permute.xlu0 %399 }
  0x94   : > { %v384_v48 = vmul.f32 %v381_v30, %v371_v24  ;;  %v412_v53 = vmul.f32 %v409_v35, %v400_v25 }
  0x98   : > { %v376_v28 = vpop.permute.xlu0 %375  ;;  %v404_v29 = vpop.permute.xlu1 %403 }
  0x99   : > { %v385_v32 = vmul.f32 %v381_v30, %v376_v28  ;;  %v413_v40 = vmul.f32 %v409_v35, %v404_v29 }
  0x9c   : > { %v356_v34 = vpop.permute.xlu0 %355 }
  0x9d   : > { %v366_v36 = vpop.permute.xlu1 %365  ;;  %v389_v37 = vadd.f32 %v385_v32, %v356_v34  ;;  %v582_v34 = vld [vmem:[%s1333_s5 + $0x10] sm:$0xff] }
  0x9e   : > { %v383_v49 = vmul.f32 %v381_v30, %v366_v36  ;;  %v1086_v36 = vmov 0.0  }
  0x9f   : > { %v417_v42 = vadd.f32 %v413_v40, %v389_v37 }
  0xa0   : > { %v351_v39 = vpop.permute.xlu0 %350 }
  0xa1   : > { %v388_v54 = vadd.f32 %v384_v48, %v351_v39 }
  0xa2   : > { %v432_v41 = vpop.permute.xlu1 %431 }
  0xa3   : > { %v441_v43 = vmul.f32 %v437_v38, %v432_v41  ;;  %v416_v59 = vadd.f32 %v412_v53, %v388_v54 }
  0xa4   : > { %v361_v44 = vpop.permute.xlu0 %360 }
  0xa5   : > { %v445_v45 = vadd.f32 %v441_v43, %v417_v42  ;;  %v382_v1 = vmul.f32 %v381_v30, %v361_v44 }
  0xa7   : > { %997 = vtanh.f32 %v445_v45  ;;  %v346_v46 = vpop.permute.xlu1 %345 }
  0xa8   : > { %v341_v47 = vpop.permute.xlu0 %340  ;;  %v387_v55 = vadd.f32 %v383_v49, %v346_v46 }
  0xa9   : > { %v386_v3 = vadd.f32 %v382_v1, %v341_v47 }
  0xac   : > { %v396_v50 = vpop.permute.xlu1 %395 }
  0xad   : > { %v411_v51 = vmul.f32 %v409_v35, %v396_v50  ;;  %v424_v52 = vpop.permute.xlu0 %423 }
  0xae   : > { %v439_v57 = vmul.f32 %v437_v38, %v424_v52  ;;  %v709_v52 = vld [vmem:[%s1335_s7] sm:$0x1] }
  0xaf   : > { %v415_v56 = vadd.f32 %v411_v51, %v387_v55 }
  0xb1   : > { %v428_v58 = vpop.permute.xlu1 %427  ;;  %v443_v62 = vadd.f32 %v439_v57, %v415_v56 }
  0xb2   : > { %v440_v60 = vmul.f32 %v437_v38, %v428_v58  ;;  %v471_v21 = vpop.permute.xlu0 %470 }
  0xb4   : > { %v998_v61 = vpop.eup %997  ;;  %v444_v63 = vadd.f32 %v440_v60, %v416_v59 }
  0xb5   : > { %900 = vmatprep.subr.mxu0 %v998_v61 }
  0xb6   : > { %999 = vtanh.f32 %v444_v63  ;;  %v392_v0 = vpop.permute.xlu1 %391  ;;  %901 = vmatpush3.msra.mxu0 %v998_v61  ;;  %v606_v37 = vpop.permute.xlu0 %605 }
  0xb7   : > { %1001 = vtanh.f32 %v443_v62  ;;  %v410_v2 = vmul.f32 %v409_v35, %v392_v0  ;;  %v583_v35 = vld [vmem:[%s1333_s5 + $0x18] sm:$0xff] }
  0xb9   : > { %v414_v5 = vadd.f32 %v410_v2, %v386_v3 }
  0xba   : > { %v596_v43 = vpop.permute.xlu0 %595 }
  0xbb   : > { %v420_v4 = vpop.permute.xlu1 %419 }
  0xbc   : > { %v438_v6 = vmul.f32 %v437_v38, %v420_v4 }
  0xbe   : > { %v442_v7 = vadd.f32 %v438_v6, %v414_v5  ;;  %v714_v54 = vpop.permute.xlu0 %713 }
  0xbf   : > { %v719_v55 = vrot.slane %v714_v54, %v380_v26 }
  0xc0   : > { %1003 = vtanh.f32 %v442_v7  ;;  %v476_v15 = vpop.permute.xlu1 %475 }
  0xc3   : > { %v1000_v8 = vpop.eup %999 }
  0xc4   : > { %902 = vmatprep.subr.mxu0 %v1000_v8  ;;  %v1002_v9 = vpop.eup %1001  ;;  %v466_v17 = vpop.permute.xlu1 %465 }
  0xc5   : > { %903 = vmatpush3.msra.mxu0 %v1000_v8 }
  0xc6   : > { %904 = vmatprep.subr.mxu0 %v1002_v9 }
  0xc7   : > { %905 = vmatpush3.msra.mxu0 %v1002_v9 }
  0xc8   : > { %v461_v27 = vpop.permute.xlu1 %460 }
  0xcc   : > { %v601_v39 = vpop.permute.xlu1 %600 }
  0xcd   : > { %v1004_v10 = vpop.eup %1003 }
  0xce   : > { %906 = vmatprep.subr.mxu0 %v1004_v10 }
  0xcf   : > { %907 = vmatpush3.msra.mxu0 %v1004_v10 }
  0xd0   : > { %909 = vmatmul.mubr.msk.f32.vlgmr.msra.gmra.mxu0 %vm478_vm0, %v451_v11  ;;  %928 = vmatprep.subr.mxu0 %v1086_v36  ;;  %v591_v47 = vpop.permute.xlu1 %590 }
  0xd1   : > { %911 = vmatprep.mubr.msk.f32.mxu0 %vm478_vm0, %v452_v12 }
  0xd4   : > { %912 = vmatmul.mubr.msk.f32.gmra.mxu0 %vm478_vm0, %v453_v13 }
  0xd5   : > { %936 = vmatprep.mubr.msk.f32.mxu0 %vm1087_vm1, %v1086_v36 }
 0x190   : > { %v910_v16 = vpop.f32.mrf.mxu0 }
 0x191   : > { %v563_v24 = vadd.f32 %v910_v16, %v466_v17 }
 0x192   : > { %v557_v18 = vpop.f32.mrf.mxu0 }
 0x193   : > { %v558_v28 = vadd.f32 %v557_v18, %v461_v27 }
 0x194   : > { %v913_v19 = vpop.f32.mrf.mxu0 }
 0x195   : > { %v573_v20 = vadd.f32 %v913_v19, %v476_v15 }
 0x196   : > { %v567_v22 = vpop.f32.mrf.mxu0 }
 0x197   : > { %1005 = vtanh.f32 %v573_v20  ;;  %v568_v25 = vadd.f32 %v567_v22, %v471_v21 }
 0x199   : > { %1007 = vtanh.f32 %v568_v25 }
 0x19a   : > { %1009 = vtanh.f32 %v563_v24 }
 0x19b   : > { %1011 = vtanh.f32 %v558_v28 }
 0x1a4   : > { %v1006_v29 = vpop.eup %1005 }
 0x1a5   : > { %914 = vmatprep.subr.mxu1 %v1006_v29 }
 0x1a6   : > { %v1008_v30 = vpop.eup %1007  ;;  %915 = vmatpush3.msra.mxu1 %v1006_v29 }
 0x1a7   : > { %916 = vmatprep.subr.mxu1 %v1008_v30  ;;  %v1010_v31 = vpop.eup %1009 }
 0x1a8   : > { %917 = vmatpush3.msra.mxu1 %v1008_v30  ;;  %v1012_v32 = vpop.eup %1011 }
 0x1a9   : > { %918 = vmatprep.subr.mxu1 %v1010_v31 }
 0x1aa   : > { %919 = vmatpush3.msra.mxu1 %v1010_v31 }
 0x1ab   : > { %920 = vmatprep.subr.mxu1 %v1012_v32 }
 0x1ac   : > { %921 = vmatpush3.msra.mxu1 %v1012_v32 }
 0x1ad   : > { %923 = vmatmul.mubr.msk.f32.vlgmr.msra.gmra.mxu1 %vm478_vm0, %v581_v33 }
 0x1ae   : > { %925 = vmatprep.mubr.msk.f32.mxu1 %vm478_vm0, %v582_v34 }
 0x1b1   : > { %926 = vmatmul.mubr.msk.f32.gmra.mxu1 %vm478_vm0, %v583_v35 }
 0x26d   : > { %v924_v38 = vpop.f32.mrf.mxu1 }
 0x26e   : > { %v692_v45 = vadd.f32 %v924_v38, %v596_v43 }
 0x26f   : > { %v686_v40 = vpop.f32.mrf.mxu1 }
 0x270   : > { %v687_v48 = vadd.f32 %v686_v40, %v591_v47 }
 0x271   : > { %v927_v41 = vpop.f32.mrf.mxu1 }
 0x272   : > { %v702_v42 = vadd.f32 %v927_v41, %v606_v37 }
 0x273   : > { %v696_v44 = vpop.f32.mrf.mxu1 }
 0x274   : > { %1013 = vtanh.f32 %v702_v42  ;;  %v697_v46 = vadd.f32 %v696_v44, %v601_v39 }
 0x276   : > { %1015 = vtanh.f32 %v697_v46 }
 0x277   : > { %1017 = vtanh.f32 %v692_v45 }
 0x278   : > { %1019 = vtanh.f32 %v687_v48 }
 0x281   : > { %v1014_v49 = vpop.eup %1013 }
 0x282   : > { %929 = vmatpush3.msra.mxu0 %v1014_v49 }
 0x283   : > { %v1016_v50 = vpop.eup %1015  ;;  %930 = vmatprep.subr.mxu0 %v1086_v36 }
 0x284   : > { %931 = vmatpush3.msra.mxu0 %v1016_v50  ;;  %v1018_v51 = vpop.eup %1017 }
 0x285   : > { %932 = vmatprep.subr.mxu0 %v1086_v36  ;;  %v1020_v53 = vpop.eup %1019 }
 0x286   : > { %933 = vmatpush3.msra.mxu0 %v1018_v51 }
 0x287   : > { %934 = vmatprep.subr.mxu0 %v1086_v36 }
 0x288   : > { %935 = vmatpush3.msra.mxu0 %v1020_v53 }
 0x289   : > { %937 = vmatmul.mubr.msk.f32.vlgmr.msra.gmra.mxu0 %vm478_vm0, %v709_v52 }
 0x349   : > { %v789_v56 = vpop.f32.mrf.mxu0 }
 0x34a   : > { %v790_v57 = vadd.f32 %v789_v56, %v719_v55 }
 0x34b   : > { %v938_v58 = vpop.f32.mrf.mxu0 }
 0x34c   : > { %793 = vst [vmem:[%s324_s27] sm:$0x1] %v790_v57 }
 0x34d   : > { %1034 = shalt.err (!%p1031_p3)
}
 0x34e   : > { %s1035_s23 = scalar_lea.hbm %s1293_s10, 16  ;;  %s1039_s26 = scalar_lea.hbm %s1337_s9, 32 }
 0x34f   : > { %p1036_p4 = scmp.ne.s32.totalorder %s1293_s10, %s1035_s23  ;;  %p1040_p9 = scmp.lt.s32.totalorder %s1293_s10, %s1337_s9 }
 0x350   : > { %p1041_p10 = scmp.lt.s32.totalorder %s1039_s26, %s1035_s23 }
 0x351   : > { %p1037_p7 = pnand %p1036_p4, %p1180_p5 }
 0x352   : > { %p1042_p11 = por %p1041_p10, %p1040_p9 }
 0x353   : > { %p1038_p8 = pneg %p1037_p7 }
 0x355   : > { %p1043_p12 = pnand %p1042_p11, %p1038_p8 }
 0x357   : > { %1046 = shalt.err (!%p1043_p12)
}
 0x358   : > { %939 = dma.vmem_to_hbm [thread:$0]  (%p1180_p5), %s808_s28, 16, %s1293_s10, %s795_s15  }
 0x359 PF: > { %p945_p13 = scmp.ge.s32.totalorder %s1081_s14, 2  ;;  %s819_s30 = sand.u32 1, %s1069_s11  }
 0x35a   : > { %s820_s17 = scalar_lea.sflag [#allocation4], %s819_s30 }
 0x35b   : > { %p942_p0 = pnand %p945_p13, %p1184_p6 }
 0x35d   : > { %p943_p1 = pneg %p942_p0 }
 0x35f   : > { %1064 = dma.done.wait (%p943_p1), %s820_s17, 16  }
 0x360   : > { %1066 = vsyncadd (%p943_p1), %s820_s17, 4294967280  ;;  %p21_p2 = scmp.ge.s32.totalorder %s1167_s16, 4   ;;  %s1340_s11 = smov %s1073_s12 }
 0x361   : > { %s1341_s12 = smov %s1077_s13  ;;  %s1342_s13 = smov %s1178_s19 }
 0x362   : > { %s1343_s14 = smov %s1167_s16  ;;  %23 = sbr.rel (!%p21_p2) target bundleno = 6 (0x6), region = 91 }
 0x367   :  { %824 = vsyncpa [#allocation4], 1 }
 0x368   :  { %826 = vsyncpa [#allocation4 + $0x1], 1 }

</bundles_post_ra>
